<compile_context>
chip_gen: v6e
topology: v6e:2x2x1
jax: 0.10.0
libtpu: 0.0.40
codegen_flags: <defaults>
</compile_context>

<pallas_src>
import math
from functools import partial

import jax
import jax.numpy as jnp
from jax import lax
from jax.experimental import pallas as pl
from jax.experimental.pallas import tpu as pltpu


def _layer_norm(v, gamma, beta, eps):
    u = jnp.mean(v, axis=-1, keepdims=True)
    c = v - u
    var = jnp.mean(c * c, axis=-1, keepdims=True)          # biased variance (correction=0)
    return gamma * (c * lax.rsqrt(var + eps)) + beta


def transformer_layer_kernel(x_q_ref, x_kv_ref,
                             g1_ref, be1_ref,
                             wq_ref, wkv_ref, wo_ref, bo_ref,
                             g2_ref, be2_ref,
                             w1_ref, b1_ref, w2_ref, b2_ref,
                             o_ref,
                             kv_ref,
                             *, num_heads, eps, neg_mask):
    tq = x_q_ref.shape[1]
    D = x_q_ref.shape[2]
    T = x_kv_ref.shape[1]
    dk = D // num_heads
    qi = pl.program_id(1)

    g1 = g1_ref[0]
    be1 = be1_ref[0]

    # ---- K/V cache for the full sequence: computed once per batch element ----
    # (q-tile axis is "arbitrary"/sequential, so qi==0 runs first for each b;
    #  the scratch persists across grid steps.)
    @pl.when(qi == 0)
    def _():
        xf = x_kv_ref[0].astype(jnp.float32)                                   # (T, D)
        x1f = _layer_norm(xf, g1, be1, eps).astype(jnp.bfloat16)
        kv = jnp.dot(x1f, wkv_ref[...], preferred_element_type=jnp.float32)    # (T, 2D)
        kv_ref[...] = kv.astype(jnp.bfloat16)

    # ---- per-query-tile path ----
    x_q = x_q_ref[0].astype(jnp.float32)                                       # (tq, D)
    x1q = _layer_norm(x_q, g1, be1, eps).astype(jnp.bfloat16)

    # Fused Q projection (1/sqrt(dk) folded into wq on the host).
    q_all = jnp.dot(x1q, wq_ref[...],
                    preferred_element_type=jnp.float32).astype(jnp.bfloat16)   # (tq, D)

    # Causal-mask bias built in-kernel per tile (mask constant pre-scaled to match
    # the module's (logits + mask) / sqrt(dk)).
    row = qi * tq + lax.broadcasted_iota(jnp.int32, (tq, T), 0)
    col = lax.broadcasted_iota(jnp.int32, (tq, T), 1)
    mask_bias = jnp.where(col >= row, jnp.float32(neg_mask), jnp.float32(0.0))

    # Static head loop: slices are static lane slabs (128-aligned whenever dk is a
    # multiple of 128); per-head live values are only (tq, T) thanks to q-tiling.
    # TODO(synk): switch to lax.fori_loop with head-major weights if H gets large.
    head_outs = []
    for h in range(num_heads):
        lo = h * dk
        q_h = q_all[:, lo:lo + dk]                                             # (tq, dk)
        k_h = kv_ref[:, lo:lo + dk]                                            # (T, dk)
        v_h = kv_ref[:, D + lo:D + lo + dk]                                    # (T, dk)
        s = lax.dot_general(q_h, k_h, (((1,), (1,)), ((), ())),
                            preferred_element_type=jnp.float32)                # (tq, T)
        s = s + mask_bias
        s = s - jnp.max(s, axis=-1, keepdims=True)
        p = jnp.exp(s)
        inv_l = 1.0 / jnp.sum(p, axis=-1, keepdims=True)                       # exact
        head_outs.append(jnp.dot((p * inv_l).astype(jnp.bfloat16), v_h,
                                 preferred_element_type=jnp.float32))          # (tq, dk)

    attn_slab = jnp.concatenate(head_outs, axis=-1).astype(jnp.bfloat16)       # (tq, D)
    attn = jnp.dot(attn_slab, wo_ref[...], preferred_element_type=jnp.float32)

    # TODO(synk): dropout layers are identity (eval-mode semantics); no RNG dropout.
    x3 = x_q + attn + bo_ref[0]

    x4 = _layer_norm(x3, g2_ref[0], be2_ref[0], eps).astype(jnp.bfloat16)

    F = w1_ref.shape[1]
    FB = 512 if (F > 512 and F % 512 == 0) else F
    inv_sqrt2 = jnp.float32(1.0 / math.sqrt(2.0))

    def ff_body(fb, acc):
        f0 = pl.multiple_of(fb * FB, FB)
        h1 = jnp.dot(x4, w1_ref[:, pl.ds(f0, FB)],
                     preferred_element_type=jnp.float32) + b1_ref[0, pl.ds(f0, FB)]
        g = 0.5 * h1 * (1.0 + lax.erf(h1 * inv_sqrt2))                         # exact GELU
        return acc + jnp.dot(g.astype(jnp.bfloat16), w2_ref[pl.ds(f0, FB), :],
                             preferred_element_type=jnp.float32)

    ff = lax.fori_loop(0, F // FB, ff_body, jnp.zeros((tq, D), jnp.float32))

    o_ref[0] = (x3 + ff + b2_ref[0]).astype(o_ref.dtype)


def _pick_q_tile(T):
    for cand in (256, 128, 64, 32, 16, 8):
        if T % cand == 0:
            return cand
    return T


def _vmem_limit_bytes():
    # Generation-aware budget: v5e/v6e have 128 MiB VMEM per TensorCore, v7x 64 MiB.
    # Leave ~8 MiB headroom for compiler scratch; cap at ~112 MiB on the big chips.
    try:
        cap = int(pltpu.get_tpu_info().vmem_capacity_bytes)
    except Exception:
        cap = 64 * 1024 * 1024
    return int(min(cap - 8 * 1024 * 1024, 112 * 1024 * 1024))


def transformer_layer(x, params, num_heads, eps=1e-5):
    B, T, D = x.shape
    dk = D // num_heads
    bf16 = jnp.bfloat16
    inv_sqrt_dk = 1.0 / math.sqrt(dk)

    # One-time host-side weight prep: fold 1/sqrt(dk) into Wq, fuse [Wk|Wv], bf16.
    wq = (params["wq"] * inv_sqrt_dk).astype(bf16)                              # (D, D)
    wkv = jnp.concatenate([params["wk"], params["wv"]], axis=1).astype(bf16)    # (D, 2D)
    wo = params["wo"].astype(bf16)
    w1 = params["w1"].astype(bf16)
    w2 = params["w2"].astype(bf16)

    tq = _pick_q_tile(T)
    nq = T // tq

    resident = pl.BlockSpec(memory_space=pltpu.MemorySpace.VMEM)  # single resident copy
    kernel = partial(transformer_layer_kernel, num_heads=num_heads, eps=eps,
                     neg_mask=-1e10 * inv_sqrt_dk)

    return pl.pallas_call(
        kernel,
        out_shape=jax.ShapeDtypeStruct((B, T, D), x.dtype),
        grid=(B, nq),
        in_specs=[
            pl.BlockSpec((1, tq, D), lambda b, qi: (b, qi, 0)),   # query-row tile
            pl.BlockSpec((1, T, D), lambda b, qi: (b, 0, 0)),     # full sequence (K/V src)
            resident, resident,                                   # gamma1, beta1
            resident, resident, resident, resident,               # Wq, Wkv, Wo, bo
            resident, resident,                                   # gamma2, beta2
            resident, resident, resident, resident,               # W1, b1, W2, b2
        ],
        out_specs=pl.BlockSpec((1, tq, D), lambda b, qi: (b, qi, 0)),
        scratch_shapes=[pltpu.VMEM((T, 2 * D), bf16)],            # per-batch K/V cache
        compiler_params=pltpu.CompilerParams(
            dimension_semantics=("parallel", "arbitrary"),
            vmem_limit_bytes=_vmem_limit_bytes(),
        ),
    )(x, x,
      params["g1"], params["be1"],
      wq, wkv, wo, params["bo"],
      params["g2"], params["be2"],
      w1, params["b1"], w2, params["b2"])


def reference_jax(x, params, num_heads, eps=1e-5):
    """Pure-JAX f32 mirror of the PyTorch forward pass (for correctness check)."""
    B, T, D = x.shape
    dk = D // num_heads

    def ln(v, g, b):
        u = jnp.mean(v, axis=-1, keepdims=True)
        var = jnp.mean((v - u) ** 2, axis=-1, keepdims=True)
        return g * ((v - u) / jnp.sqrt(var + eps)) + b

    x1 = ln(x, params["g1"][0], params["be1"][0])
    Q = x1 @ params["wq"]; K = x1 @ params["wk"]; V = x1 @ params["wv"]
    row = jnp.arange(T)[:, None]; col = jnp.arange(T)[None, :]
    cmask = jnp.where(col >= row, -1e10, 0.0).astype(jnp.float32)
    outs = []
    for h in range(num_heads):
        Qh, Kh, Vh = (A[..., h * dk:(h + 1) * dk] for A in (Q, K, V))
        logits = (jnp.einsum("btd,bsd->bts", Qh, Kh) + cmask) / math.sqrt(dk)
        S = jax.nn.softmax(logits, axis=-1)
        outs.append(jnp.einsum("bts,bsd->btd", S, Vh))
    mh = jnp.concatenate(outs, axis=-1)
    x3 = x + (mh @ params["wo"] + params["bo"][0])
    x4 = ln(x3, params["g2"][0], params["be2"][0])
    h1 = x4 @ params["w1"] + params["b1"][0]
    h1 = 0.5 * h1 * (1.0 + lax.erf(h1 / math.sqrt(2.0)))
    return x3 + (h1 @ params["w2"] + params["b2"][0])


if __name__ == "__main__":
    B, T, D, H = 2, 8, 32, 4
    F = 4 * D  # feedforward_dim default = input_dim * 4

    key = jax.random.PRNGKey(0)
    ks = jax.random.split(key, 10)
    scale = 0.1
    params = {
        "g1": jnp.ones((1, D), jnp.float32),
        "be1": jnp.zeros((1, D), jnp.float32),
        "wq": scale * jax.random.normal(ks[0], (D, D), jnp.float32),
        "wk": scale * jax.random.normal(ks[1], (D, D), jnp.float32),
        "wv": scale * jax.random.normal(ks[2], (D, D), jnp.float32),
        "wo": scale * jax.random.normal(ks[3], (D, D), jnp.float32),
        "bo": scale * jax.random.normal(ks[4], (1, D), jnp.float32),
        "g2": jnp.ones((1, D), jnp.float32),
        "be2": jnp.zeros((1, D), jnp.float32),
        "w1": scale * jax.random.normal(ks[5], (D, F), jnp.float32),
        "b1": scale * jax.random.normal(ks[6], (1, F), jnp.float32),
        "w2": scale * jax.random.normal(ks[7], (F, D), jnp.float32),
        "b2": scale * jax.random.normal(ks[8], (1, D), jnp.float32),
    }
    x = jax.random.normal(ks[9], (B, T, D), jnp.float32)

    out = transformer_layer(x, params, num_heads=H)
    out = jax.block_until_ready(out)

    ref = reference_jax(x, params, num_heads=H)
    assert out.shape == (B, T, D)
    # bf16 MXU operands with f32 accumulation -> bf16-appropriate tolerance.
    assert jnp.allclose(out, ref, rtol=2e-2, atol=2e-2), "mismatch vs JAX reference"
    print("KERNEL_OK")
</pallas_src>

<mosaic_0001>
module attributes {stable_mosaic.version = 11 : i64} {
  func.func @transformer_layer_kernel(%arg0: i32, %arg1: i32, %arg2: memref<1x8x32xf32, #tpu.memory_space<vmem>>, %arg3: memref<1x8x32xf32, #tpu.memory_space<vmem>>, %arg4: memref<1x32xf32, #tpu.memory_space<vmem>>, %arg5: memref<1x32xf32, #tpu.memory_space<vmem>>, %arg6: memref<32x32xbf16, #tpu.memory_space<vmem>>, %arg7: memref<32x64xbf16, #tpu.memory_space<vmem>>, %arg8: memref<32x32xbf16, #tpu.memory_space<vmem>>, %arg9: memref<1x32xf32, #tpu.memory_space<vmem>>, %arg10: memref<1x32xf32, #tpu.memory_space<vmem>>, %arg11: memref<1x32xf32, #tpu.memory_space<vmem>>, %arg12: memref<32x128xbf16, #tpu.memory_space<vmem>>, %arg13: memref<1x128xf32, #tpu.memory_space<vmem>>, %arg14: memref<128x32xbf16, #tpu.memory_space<vmem>>, %arg15: memref<1x32xf32, #tpu.memory_space<vmem>>, %arg16: memref<1x8x32xf32, #tpu.memory_space<vmem>>, %arg17: memref<8x64xbf16, #tpu.memory_space<vmem>>) attributes {dimension_semantics = [#tpu.dimension_semantics<parallel>, #tpu.dimension_semantics<arbitrary>], iteration_bounds = array<i64: 2, 1>, scalar_prefetch = 0 : i64, scratch_operands = 1 : i64, tpu.core_type = #tpu.core_type<tc>, window_params = [{transform_indices = @transform_0, window_bounds = array<i64: 1, 8, 32>}, {transform_indices = @transform_1, window_bounds = array<i64: 1, 8, 32>}, {pipeline_mode = #tpu.pipeline_mode<synchronous>, transform_indices = @transform_2, window_bounds = array<i64: 1, 32>}, {pipeline_mode = #tpu.pipeline_mode<synchronous>, transform_indices = @transform_3, window_bounds = array<i64: 1, 32>}, {pipeline_mode = #tpu.pipeline_mode<synchronous>, transform_indices = @transform_4, window_bounds = array<i64: 32, 32>}, {pipeline_mode = #tpu.pipeline_mode<synchronous>, transform_indices = @transform_5, window_bounds = array<i64: 32, 64>}, {pipeline_mode = #tpu.pipeline_mode<synchronous>, transform_indices = @transform_6, window_bounds = array<i64: 32, 32>}, {pipeline_mode = #tpu.pipeline_mode<synchronous>, transform_indices = @transform_7, window_bounds = array<i64: 1, 32>}, {pipeline_mode = #tpu.pipeline_mode<synchronous>, transform_indices = @transform_8, window_bounds = array<i64: 1, 32>}, {pipeline_mode = #tpu.pipeline_mode<synchronous>, transform_indices = @transform_9, window_bounds = array<i64: 1, 32>}, {pipeline_mode = #tpu.pipeline_mode<synchronous>, transform_indices = @transform_10, window_bounds = array<i64: 32, 128>}, {pipeline_mode = #tpu.pipeline_mode<synchronous>, transform_indices = @transform_11, window_bounds = array<i64: 1, 128>}, {pipeline_mode = #tpu.pipeline_mode<synchronous>, transform_indices = @transform_12, window_bounds = array<i64: 128, 32>}, {pipeline_mode = #tpu.pipeline_mode<synchronous>, transform_indices = @transform_13, window_bounds = array<i64: 1, 32>}, {transform_indices = @transform_14, window_bounds = array<i64: 1, 8, 32>}]} {
    %c0 = arith.constant 0 : index
    %c0_0 = arith.constant 0 : index
    %0 = vector.load %arg4[%c0, %c0_0] : memref<1x32xf32, #tpu.memory_space<vmem>>, vector<1x32xf32>
    %1 = vector.shape_cast %0 : vector<1x32xf32> to vector<32xf32>
    %c0_1 = arith.constant 0 : index
    %c0_2 = arith.constant 0 : index
    %2 = vector.load %arg5[%c0_1, %c0_2] : memref<1x32xf32, #tpu.memory_space<vmem>>, vector<1x32xf32>
    %3 = vector.shape_cast %2 : vector<1x32xf32> to vector<32xf32>
    %c0_i32 = arith.constant 0 : i32
    %4 = arith.cmpi eq, %arg1, %c0_i32 : i32
    %5 = arith.extui %4 : i1 to i32
    %c0_i32_3 = arith.constant 0 : i32
    %6 = arith.cmpi ne, %5, %c0_i32_3 : i32
    scf.if %6 {
      %c0_74 = arith.constant 0 : index
      %c0_75 = arith.constant 0 : index
      %c0_76 = arith.constant 0 : index
      %187 = vector.load %arg3[%c0_74, %c0_75, %c0_76] : memref<1x8x32xf32, #tpu.memory_space<vmem>>, vector<1x8x32xf32>
      %188 = vector.shape_cast %187 : vector<1x8x32xf32> to vector<8x32xf32>
      %cst_77 = arith.constant dense<0.000000e+00> : vector<8xf32>
      %189 = vector.multi_reduction <add>, %188, %cst_77 [1] : vector<8x32xf32> to vector<8xf32>
      %190 = vector.shape_cast %189 : vector<8xf32> to vector<8x1xf32>
      %cst_78 = arith.constant 3.200000e+01 : f32
      %191 = vector.broadcast %cst_78 : f32 to vector<8x1xf32>
      %192 = arith.divf %190, %191 : vector<8x1xf32>
      %193 = vector.broadcast %192 : vector<8x1xf32> to vector<8x32xf32>
      %194 = arith.subf %188, %193 : vector<8x32xf32>
      %195 = arith.mulf %194, %194 : vector<8x32xf32>
      %cst_79 = arith.constant dense<0.000000e+00> : vector<8xf32>
      %196 = vector.multi_reduction <add>, %195, %cst_79 [1] : vector<8x32xf32> to vector<8xf32>
      %197 = vector.shape_cast %196 : vector<8xf32> to vector<8x1xf32>
      %cst_80 = arith.constant 3.200000e+01 : f32
      %198 = vector.broadcast %cst_80 : f32 to vector<8x1xf32>
      %199 = arith.divf %197, %198 : vector<8x1xf32>
      %cst_81 = arith.constant 9.99999974E-6 : f32
      %200 = vector.broadcast %cst_81 : f32 to vector<8x1xf32>
      %201 = arith.addf %199, %200 : vector<8x1xf32>
      %202 = math.rsqrt %201 : vector<8x1xf32>
      %203 = vector.broadcast %202 : vector<8x1xf32> to vector<8x32xf32>
      %204 = arith.mulf %194, %203 : vector<8x32xf32>
      %205 = vector.shape_cast %1 : vector<32xf32> to vector<1x32xf32>
      %206 = vector.broadcast %205 : vector<1x32xf32> to vector<8x32xf32>
      %207 = arith.mulf %206, %204 : vector<8x32xf32>
      %208 = vector.shape_cast %3 : vector<32xf32> to vector<1x32xf32>
      %209 = vector.broadcast %208 : vector<1x32xf32> to vector<8x32xf32>
      %210 = arith.addf %207, %209 : vector<8x32xf32>
      %211 = arith.truncf %210 : vector<8x32xf32> to vector<8x32xbf16>
      %c0_82 = arith.constant 0 : index
      %c0_83 = arith.constant 0 : index
      %212 = vector.load %arg7[%c0_82, %c0_83] : memref<32x64xbf16, #tpu.memory_space<vmem>>, vector<32x64xbf16>
      %cst_84 = arith.constant dense<0.000000e+00> : vector<8x64xf32>
      %213 = tpu.matmul %211, %212, %cst_84 {dimension_numbers = #tpu.dot_dimension_numbers<[1], [0], [0], [1], [0, 0, 1, 1], [], []>} : vector<8x32xbf16>, vector<32x64xbf16>, vector<8x64xf32> -> vector<8x64xf32>
      %214 = arith.truncf %213 : vector<8x64xf32> to vector<8x64xbf16>
      %c0_85 = arith.constant 0 : index
      %c0_86 = arith.constant 0 : index
      %215 = vector.load %arg17[%c0_85, %c0_86] : memref<8x64xbf16, #tpu.memory_space<vmem>>, vector<8x64xbf16>
      tpu.vector_store %arg17[%c0_85, %c0_86], %214 {strides = array<i32>} : memref<8x64xbf16, #tpu.memory_space<vmem>>, vector<8x64xbf16>,
    } else {
    }
    %c0_4 = arith.constant 0 : index
    %c0_5 = arith.constant 0 : index
    %c0_6 = arith.constant 0 : index
    %7 = vector.load %arg2[%c0_4, %c0_5, %c0_6] : memref<1x8x32xf32, #tpu.memory_space<vmem>>, vector<1x8x32xf32>
    %8 = vector.shape_cast %7 : vector<1x8x32xf32> to vector<8x32xf32>
    %cst = arith.constant dense<0.000000e+00> : vector<8xf32>
    %9 = vector.multi_reduction <add>, %8, %cst [1] : vector<8x32xf32> to vector<8xf32>
    %10 = vector.shape_cast %9 : vector<8xf32> to vector<8x1xf32>
    %cst_7 = arith.constant 3.200000e+01 : f32
    %11 = vector.broadcast %cst_7 : f32 to vector<8x1xf32>
    %12 = arith.divf %10, %11 : vector<8x1xf32>
    %13 = vector.broadcast %12 : vector<8x1xf32> to vector<8x32xf32>
    %14 = arith.subf %8, %13 : vector<8x32xf32>
    %15 = arith.mulf %14, %14 : vector<8x32xf32>
    %cst_8 = arith.constant dense<0.000000e+00> : vector<8xf32>
    %16 = vector.multi_reduction <add>, %15, %cst_8 [1] : vector<8x32xf32> to vector<8xf32>
    %17 = vector.shape_cast %16 : vector<8xf32> to vector<8x1xf32>
    %cst_9 = arith.constant 3.200000e+01 : f32
    %18 = vector.broadcast %cst_9 : f32 to vector<8x1xf32>
    %19 = arith.divf %17, %18 : vector<8x1xf32>
    %cst_10 = arith.constant 9.99999974E-6 : f32
    %20 = vector.broadcast %cst_10 : f32 to vector<8x1xf32>
    %21 = arith.addf %19, %20 : vector<8x1xf32>
    %22 = math.rsqrt %21 : vector<8x1xf32>
    %23 = vector.broadcast %22 : vector<8x1xf32> to vector<8x32xf32>
    %24 = arith.mulf %14, %23 : vector<8x32xf32>
    %25 = vector.shape_cast %1 : vector<32xf32> to vector<1x32xf32>
    %26 = vector.broadcast %25 : vector<1x32xf32> to vector<8x32xf32>
    %27 = arith.mulf %26, %24 : vector<8x32xf32>
    %28 = vector.shape_cast %3 : vector<32xf32> to vector<1x32xf32>
    %29 = vector.broadcast %28 : vector<1x32xf32> to vector<8x32xf32>
    %30 = arith.addf %27, %29 : vector<8x32xf32>
    %31 = arith.truncf %30 : vector<8x32xf32> to vector<8x32xbf16>
    %c0_11 = arith.constant 0 : index
    %c0_12 = arith.constant 0 : index
    %32 = vector.load %arg6[%c0_11, %c0_12] : memref<32x32xbf16, #tpu.memory_space<vmem>>, vector<32x32xbf16>
    %cst_13 = arith.constant dense<0.000000e+00> : vector<8x32xf32>
    %33 = tpu.matmul %31, %32, %cst_13 {dimension_numbers = #tpu.dot_dimension_numbers<[1], [0], [0], [1], [0, 0, 1, 1], [], []>} : vector<8x32xbf16>, vector<32x32xbf16>, vector<8x32xf32> -> vector<8x32xf32>
    %34 = arith.truncf %33 : vector<8x32xf32> to vector<8x32xbf16>
    %c8_i32 = arith.constant 8 : i32
    %35 = arith.muli %arg1, %c8_i32 : i32
    %36 = tpu.iota {dimensions = array<i32: 0>} : vector<8x8xi32>
    %37 = vector.broadcast %35 : i32 to vector<8x8xi32>
    %38 = arith.addi %37, %36 : vector<8x8xi32>
    %39 = tpu.iota {dimensions = array<i32: 1>} : vector<8x8xi32>
    %40 = arith.cmpi sge, %39, %38 : vector<8x8xi32>
    %cst_14 = arith.constant -3.53553382E+9 : f32
    %cst_15 = arith.constant 0.000000e+00 : f32
    %41 = vector.broadcast %cst_14 : f32 to vector<8x8xf32>
    %42 = vector.broadcast %cst_15 : f32 to vector<8x8xf32>
    %43 = arith.select %40, %41, %42 : vector<8x8xi1>, vector<8x8xf32>
    %44 = vector.extract_strided_slice %34 {offsets = [0, 0], sizes = [8, 8], strides = [1, 1]} : vector<8x32xbf16> to vector<8x8xbf16>
    %c0_16 = arith.constant 0 : index
    %c0_17 = arith.constant 0 : index
    %45 = vector.load %arg17[%c0_16, %c0_17] : memref<8x64xbf16, #tpu.memory_space<vmem>>, vector<8x8xbf16>
    %c0_18 = arith.constant 0 : index
    %c32 = arith.constant 32 : index
    %46 = vector.load %arg17[%c0_18, %c32] : memref<8x64xbf16, #tpu.memory_space<vmem>>, vector<8x8xbf16>
    %cst_19 = arith.constant dense<0.000000e+00> : vector<8x8xf32>
    %47 = tpu.matmul %44, %45, %cst_19 {dimension_numbers = #tpu.dot_dimension_numbers<[1], [1], [0], [0], [0, 0, 1, 0], [], []>} : vector<8x8xbf16>, vector<8x8xbf16>, vector<8x8xf32> -> vector<8x8xf32>
    %48 = arith.addf %47, %43 : vector<8x8xf32>
    %cst_20 = arith.constant dense<0xFF800000> : vector<8xf32>
    %49 = vector.multi_reduction <maximumf>, %48, %cst_20 [1] : vector<8x8xf32> to vector<8xf32>
    %50 = vector.shape_cast %49 : vector<8xf32> to vector<8x1xf32>
    %51 = vector.broadcast %50 : vector<8x1xf32> to vector<8x8xf32>
    %52 = arith.subf %48, %51 : vector<8x8xf32>
    %53 = math.exp %52 : vector<8x8xf32>
    %cst_21 = arith.constant dense<0.000000e+00> : vector<8xf32>
    %54 = vector.multi_reduction <add>, %53, %cst_21 [1] : vector<8x8xf32> to vector<8xf32>
    %55 = vector.shape_cast %54 : vector<8xf32> to vector<8x1xf32>
    %cst_22 = arith.constant 1.000000e+00 : f32
    %56 = vector.broadcast %cst_22 : f32 to vector<8x1xf32>
    %57 = arith.divf %56, %55 : vector<8x1xf32>
    %58 = vector.broadcast %57 : vector<8x1xf32> to vector<8x8xf32>
    %59 = arith.mulf %53, %58 : vector<8x8xf32>
    %60 = arith.truncf %59 : vector<8x8xf32> to vector<8x8xbf16>
    %cst_23 = arith.constant dense<0.000000e+00> : vector<8x8xf32>
    %61 = tpu.matmul %60, %46, %cst_23 {dimension_numbers = #tpu.dot_dimension_numbers<[1], [0], [0], [1], [0, 0, 1, 1], [], []>} : vector<8x8xbf16>, vector<8x8xbf16>, vector<8x8xf32> -> vector<8x8xf32>
    %62 = vector.extract_strided_slice %34 {offsets = [0, 8], sizes = [8, 8], strides = [1, 1]} : vector<8x32xbf16> to vector<8x8xbf16>
    %c0_24 = arith.constant 0 : index
    %c8 = arith.constant 8 : index
    %63 = vector.load %arg17[%c0_24, %c8] : memref<8x64xbf16, #tpu.memory_space<vmem>>, vector<8x8xbf16>
    %c0_25 = arith.constant 0 : index
    %c40 = arith.constant 40 : index
    %64 = vector.load %arg17[%c0_25, %c40] : memref<8x64xbf16, #tpu.memory_space<vmem>>, vector<8x8xbf16>
    %cst_26 = arith.constant dense<0.000000e+00> : vector<8x8xf32>
    %65 = tpu.matmul %62, %63, %cst_26 {dimension_numbers = #tpu.dot_dimension_numbers<[1], [1], [0], [0], [0, 0, 1, 0], [], []>} : vector<8x8xbf16>, vector<8x8xbf16>, vector<8x8xf32> -> vector<8x8xf32>
    %66 = arith.addf %65, %43 : vector<8x8xf32>
    %cst_27 = arith.constant dense<0xFF800000> : vector<8xf32>
    %67 = vector.multi_reduction <maximumf>, %66, %cst_27 [1] : vector<8x8xf32> to vector<8xf32>
    %68 = vector.shape_cast %67 : vector<8xf32> to vector<8x1xf32>
    %69 = vector.broadcast %68 : vector<8x1xf32> to vector<8x8xf32>
    %70 = arith.subf %66, %69 : vector<8x8xf32>
    %71 = math.exp %70 : vector<8x8xf32>
    %cst_28 = arith.constant dense<0.000000e+00> : vector<8xf32>
    %72 = vector.multi_reduction <add>, %71, %cst_28 [1] : vector<8x8xf32> to vector<8xf32>
    %73 = vector.shape_cast %72 : vector<8xf32> to vector<8x1xf32>
    %cst_29 = arith.constant 1.000000e+00 : f32
    %74 = vector.broadcast %cst_29 : f32 to vector<8x1xf32>
    %75 = arith.divf %74, %73 : vector<8x1xf32>
    %76 = vector.broadcast %75 : vector<8x1xf32> to vector<8x8xf32>
    %77 = arith.mulf %71, %76 : vector<8x8xf32>
    %78 = arith.truncf %77 : vector<8x8xf32> to vector<8x8xbf16>
    %cst_30 = arith.constant dense<0.000000e+00> : vector<8x8xf32>
    %79 = tpu.matmul %78, %64, %cst_30 {dimension_numbers = #tpu.dot_dimension_numbers<[1], [0], [0], [1], [0, 0, 1, 1], [], []>} : vector<8x8xbf16>, vector<8x8xbf16>, vector<8x8xf32> -> vector<8x8xf32>
    %80 = vector.extract_strided_slice %34 {offsets = [0, 16], sizes = [8, 8], strides = [1, 1]} : vector<8x32xbf16> to vector<8x8xbf16>
    %c0_31 = arith.constant 0 : index
    %c16 = arith.constant 16 : index
    %81 = vector.load %arg17[%c0_31, %c16] : memref<8x64xbf16, #tpu.memory_space<vmem>>, vector<8x8xbf16>
    %c0_32 = arith.constant 0 : index
    %c48 = arith.constant 48 : index
    %82 = vector.load %arg17[%c0_32, %c48] : memref<8x64xbf16, #tpu.memory_space<vmem>>, vector<8x8xbf16>
    %cst_33 = arith.constant dense<0.000000e+00> : vector<8x8xf32>
    %83 = tpu.matmul %80, %81, %cst_33 {dimension_numbers = #tpu.dot_dimension_numbers<[1], [1], [0], [0], [0, 0, 1, 0], [], []>} : vector<8x8xbf16>, vector<8x8xbf16>, vector<8x8xf32> -> vector<8x8xf32>
    %84 = arith.addf %83, %43 : vector<8x8xf32>
    %cst_34 = arith.constant dense<0xFF800000> : vector<8xf32>
    %85 = vector.multi_reduction <maximumf>, %84, %cst_34 [1] : vector<8x8xf32> to vector<8xf32>
    %86 = vector.shape_cast %85 : vector<8xf32> to vector<8x1xf32>
    %87 = vector.broadcast %86 : vector<8x1xf32> to vector<8x8xf32>
    %88 = arith.subf %84, %87 : vector<8x8xf32>
    %89 = math.exp %88 : vector<8x8xf32>
    %cst_35 = arith.constant dense<0.000000e+00> : vector<8xf32>
    %90 = vector.multi_reduction <add>, %89, %cst_35 [1] : vector<8x8xf32> to vector<8xf32>
    %91 = vector.shape_cast %90 : vector<8xf32> to vector<8x1xf32>
    %cst_36 = arith.constant 1.000000e+00 : f32
    %92 = vector.broadcast %cst_36 : f32 to vector<8x1xf32>
    %93 = arith.divf %92, %91 : vector<8x1xf32>
    %94 = vector.broadcast %93 : vector<8x1xf32> to vector<8x8xf32>
    %95 = arith.mulf %89, %94 : vector<8x8xf32>
    %96 = arith.truncf %95 : vector<8x8xf32> to vector<8x8xbf16>
    %cst_37 = arith.constant dense<0.000000e+00> : vector<8x8xf32>
    %97 = tpu.matmul %96, %82, %cst_37 {dimension_numbers = #tpu.dot_dimension_numbers<[1], [0], [0], [1], [0, 0, 1, 1], [], []>} : vector<8x8xbf16>, vector<8x8xbf16>, vector<8x8xf32> -> vector<8x8xf32>
    %98 = vector.extract_strided_slice %34 {offsets = [0, 24], sizes = [8, 8], strides = [1, 1]} : vector<8x32xbf16> to vector<8x8xbf16>
    %c0_38 = arith.constant 0 : index
    %c24 = arith.constant 24 : index
    %99 = vector.load %arg17[%c0_38, %c24] : memref<8x64xbf16, #tpu.memory_space<vmem>>, vector<8x8xbf16>
    %c0_39 = arith.constant 0 : index
    %c56 = arith.constant 56 : index
    %100 = vector.load %arg17[%c0_39, %c56] : memref<8x64xbf16, #tpu.memory_space<vmem>>, vector<8x8xbf16>
    %cst_40 = arith.constant dense<0.000000e+00> : vector<8x8xf32>
    %101 = tpu.matmul %98, %99, %cst_40 {dimension_numbers = #tpu.dot_dimension_numbers<[1], [1], [0], [0], [0, 0, 1, 0], [], []>} : vector<8x8xbf16>, vector<8x8xbf16>, vector<8x8xf32> -> vector<8x8xf32>
    %102 = arith.addf %101, %43 : vector<8x8xf32>
    %cst_41 = arith.constant dense<0xFF800000> : vector<8xf32>
    %103 = vector.multi_reduction <maximumf>, %102, %cst_41 [1] : vector<8x8xf32> to vector<8xf32>
    %104 = vector.shape_cast %103 : vector<8xf32> to vector<8x1xf32>
    %105 = vector.broadcast %104 : vector<8x1xf32> to vector<8x8xf32>
    %106 = arith.subf %102, %105 : vector<8x8xf32>
    %107 = math.exp %106 : vector<8x8xf32>
    %cst_42 = arith.constant dense<0.000000e+00> : vector<8xf32>
    %108 = vector.multi_reduction <add>, %107, %cst_42 [1] : vector<8x8xf32> to vector<8xf32>
    %109 = vector.shape_cast %108 : vector<8xf32> to vector<8x1xf32>
    %cst_43 = arith.constant 1.000000e+00 : f32
    %110 = vector.broadcast %cst_43 : f32 to vector<8x1xf32>
    %111 = arith.divf %110, %109 : vector<8x1xf32>
    %112 = vector.broadcast %111 : vector<8x1xf32> to vector<8x8xf32>
    %113 = arith.mulf %107, %112 : vector<8x8xf32>
    %114 = arith.truncf %113 : vector<8x8xf32> to vector<8x8xbf16>
    %cst_44 = arith.constant dense<0.000000e+00> : vector<8x8xf32>
    %115 = tpu.matmul %114, %100, %cst_44 {dimension_numbers = #tpu.dot_dimension_numbers<[1], [0], [0], [1], [0, 0, 1, 1], [], []>} : vector<8x8xbf16>, vector<8x8xbf16>, vector<8x8xf32> -> vector<8x8xf32>
    %116 = tpu.concatenate %61, %79, %97, %115 in 1 : vector<8x8xf32>, vector<8x8xf32>, vector<8x8xf32>, vector<8x8xf32> -> vector<8x32xf32>
    %117 = arith.truncf %116 : vector<8x32xf32> to vector<8x32xbf16>
    %c0_45 = arith.constant 0 : index
    %c0_46 = arith.constant 0 : index
    %118 = vector.load %arg8[%c0_45, %c0_46] : memref<32x32xbf16, #tpu.memory_space<vmem>>, vector<32x32xbf16>
    %cst_47 = arith.constant dense<0.000000e+00> : vector<8x32xf32>
    %119 = tpu.matmul %117, %118, %cst_47 {dimension_numbers = #tpu.dot_dimension_numbers<[1], [0], [0], [1], [0, 0, 1, 1], [], []>} : vector<8x32xbf16>, vector<32x32xbf16>, vector<8x32xf32> -> vector<8x32xf32>
    %120 = arith.addf %8, %119 : vector<8x32xf32>
    %c0_48 = arith.constant 0 : index
    %c0_49 = arith.constant 0 : index
    %121 = vector.load %arg9[%c0_48, %c0_49] : memref<1x32xf32, #tpu.memory_space<vmem>>, vector<1x32xf32>
    %122 = vector.shape_cast %121 : vector<1x32xf32> to vector<32xf32>
    %123 = vector.shape_cast %122 : vector<32xf32> to vector<1x32xf32>
    %124 = vector.broadcast %123 : vector<1x32xf32> to vector<8x32xf32>
    %125 = arith.addf %120, %124 : vector<8x32xf32>
    %c0_50 = arith.constant 0 : index
    %c0_51 = arith.constant 0 : index
    %126 = vector.load %arg10[%c0_50, %c0_51] : memref<1x32xf32, #tpu.memory_space<vmem>>, vector<1x32xf32>
    %127 = vector.shape_cast %126 : vector<1x32xf32> to vector<32xf32>
    %c0_52 = arith.constant 0 : index
    %c0_53 = arith.constant 0 : index
    %128 = vector.load %arg11[%c0_52, %c0_53] : memref<1x32xf32, #tpu.memory_space<vmem>>, vector<1x32xf32>
    %129 = vector.shape_cast %128 : vector<1x32xf32> to vector<32xf32>
    %cst_54 = arith.constant dense<0.000000e+00> : vector<8xf32>
    %130 = vector.multi_reduction <add>, %125, %cst_54 [1] : vector<8x32xf32> to vector<8xf32>
    %131 = vector.shape_cast %130 : vector<8xf32> to vector<8x1xf32>
    %cst_55 = arith.constant 3.200000e+01 : f32
    %132 = vector.broadcast %cst_55 : f32 to vector<8x1xf32>
    %133 = arith.divf %131, %132 : vector<8x1xf32>
    %134 = vector.broadcast %133 : vector<8x1xf32> to vector<8x32xf32>
    %135 = arith.subf %125, %134 : vector<8x32xf32>
    %136 = arith.mulf %135, %135 : vector<8x32xf32>
    %cst_56 = arith.constant dense<0.000000e+00> : vector<8xf32>
    %137 = vector.multi_reduction <add>, %136, %cst_56 [1] : vector<8x32xf32> to vector<8xf32>
    %138 = vector.shape_cast %137 : vector<8xf32> to vector<8x1xf32>
    %cst_57 = arith.constant 3.200000e+01 : f32
    %139 = vector.broadcast %cst_57 : f32 to vector<8x1xf32>
    %140 = arith.divf %138, %139 : vector<8x1xf32>
    %cst_58 = arith.constant 9.99999974E-6 : f32
    %141 = vector.broadcast %cst_58 : f32 to vector<8x1xf32>
    %142 = arith.addf %140, %141 : vector<8x1xf32>
    %143 = math.rsqrt %142 : vector<8x1xf32>
    %144 = vector.broadcast %143 : vector<8x1xf32> to vector<8x32xf32>
    %145 = arith.mulf %135, %144 : vector<8x32xf32>
    %146 = vector.shape_cast %127 : vector<32xf32> to vector<1x32xf32>
    %147 = vector.broadcast %146 : vector<1x32xf32> to vector<8x32xf32>
    %148 = arith.mulf %147, %145 : vector<8x32xf32>
    %149 = vector.shape_cast %129 : vector<32xf32> to vector<1x32xf32>
    %150 = vector.broadcast %149 : vector<1x32xf32> to vector<8x32xf32>
    %151 = arith.addf %148, %150 : vector<8x32xf32>
    %152 = arith.truncf %151 : vector<8x32xf32> to vector<8x32xbf16>
    %cst_59 = arith.constant 0.000000e+00 : f32
    %153 = vector.broadcast %cst_59 : f32 to vector<8x32xf32>
    %cst_60 = arith.constant 0.707106769 : f32
    %c0_i32_61 = arith.constant 0 : i32
    %c128_i32 = arith.constant 128 : i32
    %154 = arith.muli %c0_i32_61, %c128_i32 : i32
    %155 = tpu.assume_multiple %154, 128 : i32
    %c0_62 = arith.constant 0 : index
    %156 = arith.index_cast %155 : i32 to index
    %157 = vector.load %arg12[%c0_62, %156] : memref<32x128xbf16, #tpu.memory_space<vmem>>, vector<32x128xbf16>
    %cst_63 = arith.constant dense<0.000000e+00> : vector<8x128xf32>
    %158 = tpu.matmul %152, %157, %cst_63 {dimension_numbers = #tpu.dot_dimension_numbers<[1], [0], [0], [1], [0, 0, 1, 1], [], []>} : vector<8x32xbf16>, vector<32x128xbf16>, vector<8x128xf32> -> vector<8x128xf32>
    %c0_64 = arith.constant 0 : index
    %159 = arith.index_cast %155 : i32 to index
    %160 = vector.load %arg13[%c0_64, %159] : memref<1x128xf32, #tpu.memory_space<vmem>>, vector<1x128xf32>
    %161 = vector.shape_cast %160 : vector<1x128xf32> to vector<128xf32>
    %162 = vector.shape_cast %161 : vector<128xf32> to vector<1x128xf32>
    %163 = vector.broadcast %162 : vector<1x128xf32> to vector<8x128xf32>
    %164 = arith.addf %158, %163 : vector<8x128xf32>
    %cst_65 = arith.constant 5.000000e-01 : f32
    %165 = vector.broadcast %cst_65 : f32 to vector<8x128xf32>
    %166 = arith.mulf %165, %164 : vector<8x128xf32>
    %167 = vector.broadcast %cst_60 : f32 to vector<8x128xf32>
    %168 = arith.mulf %164, %167 : vector<8x128xf32>
    %169 = math.erf %168 : vector<8x128xf32>
    %cst_66 = arith.constant 1.000000e+00 : f32
    %170 = vector.broadcast %cst_66 : f32 to vector<8x128xf32>
    %171 = arith.addf %170, %169 : vector<8x128xf32>
    %172 = arith.mulf %166, %171 : vector<8x128xf32>
    %173 = arith.truncf %172 : vector<8x128xf32> to vector<8x128xbf16>
    %174 = arith.index_cast %155 : i32 to index
    %c0_67 = arith.constant 0 : index
    %175 = vector.load %arg14[%174, %c0_67] : memref<128x32xbf16, #tpu.memory_space<vmem>>, vector<128x32xbf16>
    %cst_68 = arith.constant dense<0.000000e+00> : vector<8x32xf32>
    %176 = tpu.matmul %173, %175, %cst_68 {dimension_numbers = #tpu.dot_dimension_numbers<[1], [0], [0], [1], [0, 0, 1, 1], [], []>} : vector<8x128xbf16>, vector<128x32xbf16>, vector<8x32xf32> -> vector<8x32xf32>
    %177 = arith.addf %153, %176 : vector<8x32xf32>
    %c1_i32 = arith.constant 1 : i32
    %178 = arith.addf %125, %177 : vector<8x32xf32>
    %c0_69 = arith.constant 0 : index
    %c0_70 = arith.constant 0 : index
    %179 = vector.load %arg15[%c0_69, %c0_70] : memref<1x32xf32, #tpu.memory_space<vmem>>, vector<1x32xf32>
    %180 = vector.shape_cast %179 : vector<1x32xf32> to vector<32xf32>
    %181 = vector.shape_cast %180 : vector<32xf32> to vector<1x32xf32>
    %182 = vector.broadcast %181 : vector<1x32xf32> to vector<8x32xf32>
    %183 = arith.addf %178, %182 : vector<8x32xf32>
    %c0_71 = arith.constant 0 : index
    %c0_72 = arith.constant 0 : index
    %c0_73 = arith.constant 0 : index
    %184 = vector.load %arg16[%c0_71, %c0_72, %c0_73] : memref<1x8x32xf32, #tpu.memory_space<vmem>>, vector<1x8x32xf32>
    %185 = vector.shape_cast %184 : vector<1x8x32xf32> to vector<8x32xf32>
    %186 = vector.shape_cast %183 : vector<8x32xf32> to vector<1x8x32xf32>
    tpu.vector_store %arg16[%c0_71, %c0_72, %c0_73], %186 {strides = array<i32>} : memref<1x8x32xf32, #tpu.memory_space<vmem>>, vector<1x8x32xf32>,
    return
  }
  func.func @transform_0(%arg0: i32, %arg1: i32) -> (i32, i32, i32) {
    %c0_i32 = arith.constant 0 : i32
    %c0_i32_0 = arith.constant 0 : i32
    return %arg0, %arg1, %c0_i32 : i32, i32, i32
  }
  func.func @transform_1(%arg0: i32, %arg1: i32) -> (i32, i32, i32) {
    %c0_i32 = arith.constant 0 : i32
    %c0_i32_0 = arith.constant 0 : i32
    %c0_i32_1 = arith.constant 0 : i32
    return %arg0, %c0_i32, %c0_i32_0 : i32, i32, i32
  }
  func.func @transform_2(%arg0: i32, %arg1: i32) -> (i32, i32) {
    %c0_i32 = arith.constant 0 : i32
    %c0_i32_0 = arith.constant 0 : i32
    %c0_i32_1 = arith.constant 0 : i32
    return %c0_i32, %c0_i32_0 : i32, i32
  }
  func.func @transform_3(%arg0: i32, %arg1: i32) -> (i32, i32) {
    %c0_i32 = arith.constant 0 : i32
    %c0_i32_0 = arith.constant 0 : i32
    %c0_i32_1 = arith.constant 0 : i32
    return %c0_i32, %c0_i32_0 : i32, i32
  }
  func.func @transform_4(%arg0: i32, %arg1: i32) -> (i32, i32) {
    %c0_i32 = arith.constant 0 : i32
    %c0_i32_0 = arith.constant 0 : i32
    %c0_i32_1 = arith.constant 0 : i32
    return %c0_i32, %c0_i32_0 : i32, i32
  }
  func.func @transform_5(%arg0: i32, %arg1: i32) -> (i32, i32) {
    %c0_i32 = arith.constant 0 : i32
    %c0_i32_0 = arith.constant 0 : i32
    %c0_i32_1 = arith.constant 0 : i32
    return %c0_i32, %c0_i32_0 : i32, i32
  }
  func.func @transform_6(%arg0: i32, %arg1: i32) -> (i32, i32) {
    %c0_i32 = arith.constant 0 : i32
    %c0_i32_0 = arith.constant 0 : i32
    %c0_i32_1 = arith.constant 0 : i32
    return %c0_i32, %c0_i32_0 : i32, i32
  }
  func.func @transform_7(%arg0: i32, %arg1: i32) -> (i32, i32) {
    %c0_i32 = arith.constant 0 : i32
    %c0_i32_0 = arith.constant 0 : i32
    %c0_i32_1 = arith.constant 0 : i32
    return %c0_i32, %c0_i32_0 : i32, i32
  }
  func.func @transform_8(%arg0: i32, %arg1: i32) -> (i32, i32) {
    %c0_i32 = arith.constant 0 : i32
    %c0_i32_0 = arith.constant 0 : i32
    %c0_i32_1 = arith.constant 0 : i32
    return %c0_i32, %c0_i32_0 : i32, i32
  }
  func.func @transform_9(%arg0: i32, %arg1: i32) -> (i32, i32) {
    %c0_i32 = arith.constant 0 : i32
    %c0_i32_0 = arith.constant 0 : i32
    %c0_i32_1 = arith.constant 0 : i32
    return %c0_i32, %c0_i32_0 : i32, i32
  }
  func.func @transform_10(%arg0: i32, %arg1: i32) -> (i32, i32) {
    %c0_i32 = arith.constant 0 : i32
    %c0_i32_0 = arith.constant 0 : i32
    %c0_i32_1 = arith.constant 0 : i32
    return %c0_i32, %c0_i32_0 : i32, i32
  }
  func.func @transform_11(%arg0: i32, %arg1: i32) -> (i32, i32) {
    %c0_i32 = arith.constant 0 : i32
    %c0_i32_0 = arith.constant 0 : i32
    %c0_i32_1 = arith.constant 0 : i32
    return %c0_i32, %c0_i32_0 : i32, i32
  }
  func.func @transform_12(%arg0: i32, %arg1: i32) -> (i32, i32) {
    %c0_i32 = arith.constant 0 : i32
    %c0_i32_0 = arith.constant 0 : i32
    %c0_i32_1 = arith.constant 0 : i32
    return %c0_i32, %c0_i32_0 : i32, i32
  }
  func.func @transform_13(%arg0: i32, %arg1: i32) -> (i32, i32) {
    %c0_i32 = arith.constant 0 : i32
    %c0_i32_0 = arith.constant 0 : i32
    %c0_i32_1 = arith.constant 0 : i32
    return %c0_i32, %c0_i32_0 : i32, i32
  }
  func.func @transform_14(%arg0: i32, %arg1: i32) -> (i32, i32, i32) {
    %c0_i32 = arith.constant 0 : i32
    %c0_i32_0 = arith.constant 0 : i32
    return %arg0, %arg1, %c0_i32 : i32, i32, i32
  }
}

</mosaic_0001>

<bundles_post_ra>
// kernel: tpu_custom_call.1
= control target key start
LH: loop header
LB: loop body
LE: loop exit
PB: predicated region body
PF: predicated region fallthrough
CT: control target
= control target key end

     0   :  { %19 = vsyncpa [#allocation4], 0  ;;  %s2476_s0 = inlined_call_operand.vmem [shape: f32[2,8,32], index: 0, kind: input, shape index: {}]   ;;  %s2477_s1 = inlined_call_operand.vmem [shape: f32[2,8,32], index: 1, kind: input, shape index: {}]   ;;  %s2478_s2 = inlined_call_operand.vmem [shape: f32[1,32], index: 2, kind: input, shape index: {}]   ;;  %s2479_s3 = inlined_call_operand.vmem [shape: f32[1,32], index: 3, kind: input, shape index: {}]   ;;  %s2480_s4 = inlined_call_operand.vmem [shape: bf16[32,32], index: 4, kind: input, shape index: {}]   ;;  %s2481_s5 = inlined_call_operand.vmem [shape: bf16[32,64], index: 5, kind: input, shape index: {}]   ;;  %s2482_s6 = inlined_call_operand.vmem [shape: bf16[32,32], index: 6, kind: input, shape index: {}]   ;;  %s2483_s7 = inlined_call_operand.vmem [shape: f32[1,32], index: 7, kind: input, shape index: {}]   ;;  %s2484_s8 = inlined_call_operand.vmem [shape: f32[1,32], index: 8, kind: input, shape index: {}]   ;;  %s2485_s9 = inlined_call_operand.vmem [shape: f32[1,32], index: 9, kind: input, shape index: {}]   ;;  %s2486_s10 = inlined_call_operand.hbm [shape: bf16[32,128], index: 10, kind: input, shape index: {}]   ;;  %s2487_s11 = inlined_call_operand.hbm [shape: f32[1,128], index: 11, kind: input, shape index: {}]   ;;  %s2488_s12 = inlined_call_operand.vmem [shape: bf16[128,32], index: 12, kind: input, shape index: {}]   ;;  %s2489_s13 = inlined_call_operand.vmem [shape: f32[1,32], index: 13, kind: input, shape index: {}]   ;;  %s2490_s14 = inlined_call_operand.hbm [shape: f32[2,8,32], index: 14, kind: output, shape index: {}]  }
   0x1   :  { %20 = vsyncpa [#allocation7], 0 }
   0x2   :  { %21 = vsyncpa [#allocation5], 0 }
   0x3   :  { %23 = vsyncpa [#allocation5 + $0x1], 0  ;;  %s2152_s29 = smov 0   ;;  %s2154_s30 = smov 0  }
   0x4   :  { %s2156_s15 = smov 0   ;;  %s2158_s16 = smov 0  }
   0x5   :  { %s2160_s17 = smov 0   ;;  %s2162_s18 = smov 0  }
   0x6 LB: > { %2498 = sst [smem:[#allocation12_spill]] %s2038_s29  ;;  %s1602_s19 = sadd.s32 4294967295, %s2058_s18   ;;  %s2058_s18 = sphi %s2162_s18, %s29_s18   ;;  %s2054_s17 = sphi %s2160_s17, %s2517_s17   ;;  %s2050_s16 = sphi %s2158_s16, %s2516_s16   ;;  %s2046_s15 = sphi %s2156_s15, %s2515_s15   ;;  %s2042_s30 = sphi %s2154_s30, %s2519_s30   ;;  %s2038_s29 = sphi %s2152_s29, %s2518_s29  }
   0x7   : > { %2499 = sst [smem:[#allocation13_spill]] %s2046_s15  ;;  %s1603_s20 = sadd.s32 4294967294, %s2058_s18  }
   0x8   : > { %2500 = sst [smem:[#allocation14_spill]] %s2054_s17  ;;  %s41_s21 = sadd.s32 1, %s2054_s17 }
   0x9   : > { %2501 = sst [smem:[#allocation15_spill]] %s2058_s18  ;;  %s356_s22 = sadd.s32 1, %s2046_s15 }
   0xa   : > { %p43_p0 = scmp.ge.s32.totalorder %s41_s21, 2  ;;  %p366_p1 = scmp.ne.s32.totalorder %s2046_s15, %s2042_s30 }
   0xb   : > { %p367_p2 = scmp.eq.s32.totalorder %s1602_s19, 1  ;;  %p372_p3 = scmp.ne.s32.totalorder %s2042_s30, %s2038_s29 }
   0xc   : > { %s2521_s21 = smov (%p43_p0, %s41_s21), 0  ;;  %p373_p5 = scmp.eq.s32.totalorder %s1603_s20, 1 }
   0xd   : > { %2502 = sst [smem:[#allocation16_spill]] %s2521_s21  ;;  %p2192_p4 = por %p367_p2, %p366_p1 }
   0xe   : > { %s351_s24 = ssub.s32 %s2054_s17, %s2521_s21  ;;  %p1604_p6 = scmp.ge.s32.totalorder %s2058_s18, 1 }
   0xf   : > { %p354_p7 = scmp.eq.s32.totalorder %s351_s24, 0  ;;  %p2199_p8 = por %p373_p5, %p372_p3 }
  0x10   : > { %p380_p9 = scmp.lt.s32.totalorder %s2058_s18, 3  ;;  %p2211_p11 = scmp.eq.s32.totalorder %s1602_s19, 0 }
  0x11   : > { %s2504_s25 = scalar_select %p2199_p8, 1, 0 }
  0x12   : > { %s2205_s26 = scalar_select %p354_p7, %s2046_s15, %s356_s22  }
  0x13   : > { %2505 = sst [smem:[#allocation17_spill]] %s2504_s25  ;;  %p2207_p10 = pnand %p1604_p6, %p380_p9 }
  0x14   : > { %2506 = sst [smem:[#allocation18_spill]] %s2205_s26  ;;  %s2060_s20 = smov [#allocation3]  }
  0x15   : > { %p1801_p12 = pneg %p2207_p10  ;;  %s416_s24 = sshll.u32 %s2060_s20, 4  ;;  %s417_s24 = int_to_ptr.vmem [resolvable:$true] %s416_s24 }
  0x16   : > { %s2061_s22 = smov [#allocation6]   ;;  %s1933_s19 = scalar_lea.vmem %s417_s24, 256 }
  0x17   : > { %p2219_p13 = pnand %p2211_p11, %p1801_p12  ;;  %s430_s17 = sshll.u32 %s2061_s22, 4  ;;  %s431_s17 = int_to_ptr.vmem [resolvable:$true] %s430_s17 }
  0x18   : > { %p1934_p1 = scmp.ne.s32.totalorder %s417_s24, %s1933_s19  ;;  %p1941_p5 = scmp.lt.s32.totalorder %s417_s24, %s417_s24 }
  0x19   : > { %p1924_p0 = pneg %p2219_p13  ;;  %p1942_p6 = scmp.lt.s32.totalorder %s1933_s19, %s1933_s19 }
  0x1b   : > { %p1936_p2 = pnand %p1934_p1, %p1924_p0  ;;  %p1943_p7 = por %p1942_p6, %p1941_p5 }
  0x1d   : > { %p1937_p3 = pneg %p1936_p2 }
  0x1f   : > { %p1944_p9 = pnand %p1943_p7, %p1937_p3 }
  0x21   : > { %1947 = shalt.err (!%p1944_p9)
}
  0x22   : > { %s2062_s20 = smov 64   ;;  %s2063_s26 = smov 4  }
  0x23   : > { %1804 = dma.hbm_to_vmem [thread:$0]  (!%p2219_p13), %s2486_s10, 256, %s417_s24, [#allocation4], %s2062_s20, %s2062_s20, %s2063_s26  }
  0x24   : > { %s1959_s25 = scalar_lea.vmem %s431_s17, 16  ;;  %s1966_s29 = scalar_lea.vmem %s431_s17, 32 }
  0x25   : > { %p1960_p12 = scmp.ne.s32.totalorder %s431_s17, %s1959_s25  ;;  %p1967_p8 = scmp.lt.s32.totalorder %s431_s17, %s431_s17 }
  0x26   : > { %p1968_p5 = scmp.lt.s32.totalorder %s1966_s29, %s1959_s25 }
  0x27   : > { %p1962_p1 = pnand %p1960_p12, %p1924_p0 }
  0x28   : > { %p1969_p3 = por %p1968_p5, %p1967_p8 }
  0x29   : > { %p1963_p2 = pneg %p1962_p1 }
  0x2b   : > { %p1970_p6 = pnand %p1969_p3, %p1963_p2 }
  0x2d   : > { %1973 = shalt.err (!%p1970_p6)
}
  0x2e   : > { %1807 = dma.hbm_to_vmem [thread:$0]  (!%p2219_p13), %s2487_s11, 16, %s431_s17, [#allocation7]  }
  0x2f   : > { %466 = sbr.rel (%p2207_p10) target bundleno = 2512 (0x9d0), region = 76 }
  0x34   : > { %2025 = dma.done.wait (%p2211_p11), [#allocation4], 256  }
  0x35   : > { %2027 = vsyncadd (%p2211_p11), [#allocation4], 4294967040 }
  0x36   : > { %2029 = dma.done.wait (%p2211_p11), [#allocation7], 16  }
  0x37   : > { %2031 = vsyncadd (%p2211_p11), [#allocation7], 4294967280  ;;  %p522_p8 = scmp.lt.s32.totalorder %s2050_s16, 1  ;;  %vm541_vm0 = vcmask 261120   ;;  %v1881_v14 = vld [vmem:[%s2481_s5 + $0x8] sm:$0xff]   ;;  %v2064_v15 = vmov 0.0   ;;  %v557_v59 = vlaneseq }
  0x38   : > { %1691 = vmatprep.subr.bf16.mxu1 %v2064_v15  ;;  %vm2065_vm1 = vmmov 0   ;;  %v1882_v16 = vld [vmem:[%s2481_s5] sm:$0xff]   ;;  %1719 = vmatprep.subr.bf16.mxu0 %v2064_v15  ;;  %v1883_v31 = vld [vmem:[%s2480_s4 + $0x8] sm:$0xff]   ;;  %vm631_vm2 = vcmask 519168   ;;  %vm734_vm3 = vcmask 64512   ;;  %s2067_s28 = smov 112  }
  0x39   : > { %s523_s29 = scalar_select %p522_p8, %s2050_s16, 1  ;;  %1695 = vmatprep.mubr.msk.bf16.mxu1 %vm2065_vm1, %v2064_v15  ;;  %1692 = vmatpush3.bf16.msra.mxu1 %v1881_v14  ;;  %v1652_v24 = vld [vmem:[%s2478_s2] ss:$0 sm:$0xff]  ;;  %v558_v60 = vshrl.u32 %v557_v59, 7  ;;  %v730_v61 = vand.u32 127, %v557_v59  ;;  %vm802_vm5 = vcmask 1043456  }
  0x3a   : > { %1693 = vmatprep.subr.bf16.mxu1 %v2064_v15  ;;  %1721 = vmatprep.mubr.msk.bf16.mxu0 %vm2065_vm1, %v2064_v15  ;;  %v1653_v26 = vld [vmem:[%s2479_s3] ss:$0 sm:$0xff]  ;;  %s2068_s24 = smov 104   ;;  %s2069_s20 = smov 88   ;;  %vm1193_vm6 = vcmask 130048   ;;  %vm1195_vm7 = vcmask 195584  }
  0x3b   : > { %s1612_s15 = sshll.u32 %s523_s29, 3  ;;  %v1884_v34 = vld [vmem:[%s2480_s4] sm:$0xff]   ;;  %vm731_vm4 = vcmp.ge.s32.totalorder %v730_v61, %v558_v60  ;;  %s2070_s22 = smov 80  }
  0x3c   : > { %s532_s21 = scalar_lea.vmem %s2477_s1, %s1612_s15  ;;  %s528_s27 = scalar_lea.vmem %s2476_s0, %s1612_s15  ;;  %v732_v62 = vsel %vm731_vm4, -3.5355338e+09, %v2064_v15 }
  0x3d   : > { %v540_v0 = vld [vmem:[%s532_s21] sm:$0xff]  ;;  %1694 = vmatpush3.bf16.msra.mxu1 %v1882_v16  ;;  %s2071_s19 = smov 96   ;;  %s2072_s29 = smov 72  }
  0x3e   : > { %v2259_v1 = vld [vmem:[%s528_s27] sm:$0xff]  ;;  %v542_v2 = vsel %vm541_vm0, %v540_v0, 0.0  ;;  %1699 = vmatprep.subr.bf16.mxu1 %v2064_v15  ;;  %s2066_s27 = smov 120   ;;  %s2073_s25 = smov 8  }
  0x3f   : > { %v635_v3 = vsel %vm541_vm0, %v2259_v1, 0.0  ;;  %543 = vadd.xlane.f32.xlu0 %v542_v2  ;;  %s2074_s26 = smov 16   ;;  %s519_s21 = sand.u32 1, %s2042_s30  }
  0x40   : > { %s2076_s17 = smov [#allocation8]  }
  0x41   : > { %s1978_s18 = sshll.u32 %s2076_s17, 4  ;;  %s1979_s18 = int_to_ptr.vmem [resolvable:$false] %s1978_s18 }
  0x43   : > { %636 = vadd.xlane.f32.xlu0 %v635_v3 }
  0xc8   : > { %v544_v4 = vpop.xlane.xlu0 %543 }
  0xc9   : > { %v546_v5 = vmul.f32 0.03125, %v544_v4 }
  0xcb   : > { %v547_v6 = vsub.f32 %v540_v0, %v546_v5 }
  0xcc   : > { %v637_v7 = vpop.xlane.xlu0 %636 }
  0xcd   : > { %v639_v8 = vmul.f32 0.03125, %v637_v7  ;;  %v548_v9 = vmul.f32 %v547_v6, %v547_v6 }
  0xcf   : > { %v640_v10 = vsub.f32 %v2259_v1, %v639_v8  ;;  %v549_v11 = vsel %vm541_vm0, %v548_v9, 0.0 }
  0xd0   : > { %550 = vadd.xlane.f32.xlu1 %v549_v11 }
  0xd1   : > { %v641_v12 = vmul.f32 %v640_v10, %v640_v10 }
  0xd3   : > { %v642_v13 = vsel %vm541_vm0, %v641_v12, 0.0 }
  0xd4   : > { %643 = vadd.xlane.f32.xlu1 %v642_v13 }
 0x159   : > { %v551_v17 = vpop.xlane.xlu1 %550 }
 0x15a   : > { %v552_v18 = vmul.f32 0.03125, %v551_v17 }
 0x15c   : > { %v553_v19 = vadd.f32 1e-05, %v552_v18 }
 0x15d   : > { %v644_v20 = vpop.xlane.xlu1 %643 }
 0x15e   : > { %1898 = vrsqrt.f32 %v553_v19  ;;  %v645_v21 = vmul.f32 0.03125, %v644_v20 }
 0x160   : > { %v646_v22 = vadd.f32 1e-05, %v645_v21 }
 0x162   : > { %1900 = vrsqrt.f32 %v646_v22 }
 0x16b   : > { %v1899_v23 = vpop.eup %1898 }
 0x16c   : > { %v555_v25 = vmul.f32 %v1899_v23, %v547_v6 }
 0x16e   : > { %v562_v27 = vmul.f32 %v1652_v24, %v555_v25 }
 0x16f   : > { %v1901_v28 = vpop.eup %1900 }
 0x170   : > { %v569_v29 = vadd.f32 %v1653_v26, %v562_v27  ;;  %v648_v30 = vmul.f32 %v1901_v28, %v640_v10 }
 0x172   : > { %v570_v32 = vpack.c.bf16 %v569_v29, %v569_v29  ;;  %v655_v33 = vmul.f32 %v1652_v24, %v648_v30 }
 0x174   : > { %1696 = vmatmul.mubr.msk.bf16.vlgmr.msra.gmra.mxu1 %vm541_vm0, %v570_v32  ;;  %v662_v35 = vadd.f32 %v1653_v26, %v655_v33 }
 0x175   : > { %1700 = vmatpush3.bf16.msra.mxu1 %v1883_v31  ;;  %1703 = vmatprep.mubr.msk.bf16.mxu1 %vm2065_vm1, %v2064_v15 }
 0x176   : > { %1701 = vmatprep.subr.bf16.mxu1 %v2064_v15  ;;  %v663_v36 = vpack.c.bf16 %v662_v35, %v662_v35 }
 0x179   : > { %1702 = vmatpush3.bf16.msra.mxu1 %v1884_v34 }
 0x17a   : > { %1707 = vmatprep.subr.bf16.mxu1 %v2064_v15 }
 0x17c   : > { %1704 = vmatmul.mubr.msk.bf16.vlgmr.msra.gmra.mxu1 %vm541_vm0, %v663_v36 }
 0x17d   : > { %1709 = vmatprep.mubr.msk.bf16.mxu1 %vm2065_vm1, %v2064_v15 }
 0x234   : > { %v624_v37 = vpop.f32.mrf.mxu1 }
 0x235   : > { %v630_v38 = vpack.c.bf16 %v624_v37, %v624_v37 }
 0x236   : > { %v1697_v39 = vpop.f32.mrf.mxu1 }
 0x237   : > { %632 = vst.msk [vmem:[#allocation2] sm:$0xf] %vm631_vm2, %v630_v38 }
 0x238   : > { %v627_v40 = vpop.f32.mrf.mxu1 }
 0x23a   : > { %v1698_v41 = vpop.f32.mrf.mxu1 }
 0x23c   : > { %v717_v42 = vpop.f32.mrf.mxu1 }
 0x23d   : > { %v723_v43 = vpack.c.bf16 %v717_v42, %v717_v42 }
 0x23e   : > { %v1705_v44 = vpop.f32.mrf.mxu1  ;;  %v733_v45 = vld [vmem:[#allocation2] sm:$0xf] }
 0x23f   : > { %847 = vrot.lane.b32.xlu1 %v723_v43, %s2066_s27  ;;  %v739_v46 = vsel %vm734_vm3, %v733_v45, 0  ;;  %v2302_v47 = vcombine.low %v733_v45, %v733_v45 }
 0x240   : > { %v720_v48 = vpop.f32.mrf.mxu1  ;;  %1708 = vmatpush3.bf16.xpose.msra.mxu1 %v739_v46 }
 0x241   : > { %849 = vrot.lane.b32.xlu0 %v2302_v47, %s2066_s27  ;;  %1713 = vmatprep.subr.bf16.mxu1 %v2064_v15  ;;  %s2075_s27 = smov 24  }
 0x242   : > { %v1706_v49 = vpop.f32.mrf.mxu1 }
 0x243   : > { %960 = vrot.lane.b32.xlu1 %v2302_v47, %s2067_s28 }
 0x245   : > { %1071 = vrot.lane.b32.xlu0 %v2302_v47, %s2068_s24 }
 0x247   : > { %958 = vrot.lane.b32.xlu1 %v723_v43, %s2067_s28  ;;  %1710 = vmatmul.mubr.msk.bf16.vlgmr.msra.gmra.mxu1 %vm734_vm3, %v723_v43  ;;  %s1649_s28 = sshll.u32 %s2050_s16, 7  ;;  %s1483_s16 = scalar_lea.sflag [#allocation5], %s519_s21 }
 0x248   : > { %1715 = vmatprep.mubr.msk.bf16.mxu1 %vm2065_vm1, %v2064_v15 }
 0x24b   : > { %1069 = vrot.lane.b32.xlu1 %v723_v43, %s2068_s24 }
 0x2b1   : > { %v848_v50 = vpop.permute.xlu1 %847 }
 0x2b3   : > { %v850_v51 = vpop.permute.xlu0 %849 }
 0x2b4   : > { %v855_v52 = vsel %vm734_vm3, %v850_v51, 0 }
 0x2b5   : > { %1720 = vmatpush3.bf16.xpose.msra.mxu0 %v855_v52  ;;  %v961_v53 = vpop.permute.xlu1 %960 }
 0x2b6   : > { %1731 = vmatprep.subr.bf16.mxu0 %v2064_v15  ;;  %v966_v54 = vsel %vm734_vm3, %v961_v53, 0 }
 0x2b7   : > { %v1072_v55 = vpop.permute.xlu0 %1071 }
 0x2b8   : > { %v1077_v57 = vsel %vm734_vm3, %v1072_v55, 0 }
 0x2b9   : > { %v959_v56 = vpop.permute.xlu1 %958 }
 0x2bc   : > { %1722 = vmatmul.mubr.msk.bf16.vlgmr.msra.gmra.mxu0 %vm734_vm3, %v848_v50 }
 0x2bd   : > { %1732 = vmatpush3.bf16.xpose.msra.mxu0 %v966_v54  ;;  %1733 = vmatprep.mubr.msk.bf16.mxu0 %vm2065_vm1, %v2064_v15  ;;  %v1070_v58 = vpop.permute.xlu1 %1069 }
 0x2be   : > { %1743 = vmatprep.subr.bf16.mxu0 %v2064_v15 }
 0x2c4   : > { %1734 = vmatmul.mubr.msk.bf16.vlgmr.msra.gmra.mxu0 %vm734_vm3, %v959_v56 }
 0x2c5   : > { %1744 = vmatpush3.bf16.xpose.msra.mxu0 %v1077_v57  ;;  %1745 = vmatprep.mubr.msk.bf16.mxu0 %vm2065_vm1, %v2064_v15 }
 0x2c6   : > { %1755 = vmatprep.subr.bf16.mxu0 %v2064_v15 }
 0x2cc   : > { %1746 = vmatmul.mubr.msk.bf16.vlgmr.msra.gmra.mxu0 %vm734_vm3, %v1070_v58 }
 0x2cd   : > { %1759 = vmatprep.mubr.msk.bf16.mxu0 %vm2065_vm1, %v2064_v15 }
 0x307   : > { %v775_v63 = vpop.f32.mrf.mxu1 }
 0x308   : > { %v776_v0 = vadd.f32 %v775_v63, %v732_v62 }
 0x309   : > { %v1711_v2 = vpop.f32.mrf.mxu1 }
 0x30a   : > { %v781_v3 = vsel %vm734_vm3, %v776_v0, -inf }
 0x30b   : > { %782 = vmax.xlane.f32.xlu0 %v781_v3  ;;  %v778_v4 = vpop.f32.mrf.mxu1 }
 0x30d   : > { %v1712_v5 = vpop.f32.mrf.mxu1 }
 0x37c   : > { %v891_v6 = vpop.f32.mrf.mxu0 }
 0x37d   : > { %v892_v7 = vadd.f32 %v891_v6, %v732_v62 }
 0x37e   : > { %v1723_v8 = vpop.f32.mrf.mxu0 }
 0x37f   : > { %v897_v9 = vsel %vm734_vm3, %v892_v7, -inf }
 0x380   : > { %898 = vmax.xlane.f32.xlu1 %v897_v9  ;;  %v894_v10 = vpop.f32.mrf.mxu0  ;;  %v1886_v9 = vld [vmem:[%s2482_s6 + $0x8] sm:$0xff]  }
 0x381   : > { %1756 = vmatpush3.bf16.msra.mxu0 %v1886_v9 }
 0x382   : > { %v1724_v11 = vpop.f32.mrf.mxu0  ;;  %1757 = vmatprep.subr.bf16.mxu0 %v2064_v15 }
 0x383   : > { %v1887_v11 = vld [vmem:[%s2482_s6] sm:$0xff]  }
 0x384   : > { %v1002_v12 = vpop.f32.mrf.mxu0 }
 0x385   : > { %v1003_v13 = vadd.f32 %v1002_v12, %v732_v62  ;;  %1758 = vmatpush3.bf16.msra.mxu0 %v1887_v11 }
 0x386   : > { %v1735_v14 = vpop.f32.mrf.mxu0  ;;  %1771 = vmatprep.subr.bf16.mxu0 %v2064_v15 }
 0x387   : > { %v1008_v16 = vsel %vm734_vm3, %v1003_v13, -inf }
 0x388   : > { %v1005_v17 = vpop.f32.mrf.mxu0  ;;  %1009 = vmax.xlane.f32.xlu0 %v1008_v16 }
 0x38a   : > { %v1736_v18 = vpop.f32.mrf.mxu0 }
 0x38c   : > { %v1113_v19 = vpop.f32.mrf.mxu0 }
 0x38d   : > { %v1114_v20 = vadd.f32 %v1113_v19, %v732_v62 }
 0x38e   : > { %v1747_v21 = vpop.f32.mrf.mxu0 }
 0x38f   : > { %v1119_v22 = vsel %vm734_vm3, %v1114_v20, -inf }
 0x390   : > { %v1116_v23 = vpop.f32.mrf.mxu0  ;;  %1120 = vmax.xlane.f32.xlu0 %v1119_v22 }
 0x392   : > { %v1748_v24 = vpop.f32.mrf.mxu0 }
 0x394   : > { %v783_v25 = vpop.xlane.xlu0 %782 }
 0x395   : > { %v784_v26 = vsub.f32 %v776_v0, %v783_v25 }
 0x397   : > { %v785_v27 = vmul.f32 1.442695, %v784_v26 }
 0x399   : > { %1902 = vpow2.f32 %v785_v27 }
 0x3a6   : > { %v1903_v28 = vpop.eup %1902 }
 0x3a7   : > { %v787_v29 = vsel %vm734_vm3, %v1903_v28, 0.0 }
 0x3a8   : > { %788 = vadd.xlane.f32.xlu0 %v787_v29 }
 0x409   : > { %v899_v30 = vpop.xlane.xlu1 %898 }
 0x40a   : > { %v900_v31 = vsub.f32 %v892_v7, %v899_v30 }
 0x40c   : > { %v901_v32 = vmul.f32 1.442695, %v900_v31 }
 0x40e   : > { %1904 = vpow2.f32 %v901_v32 }
 0x411   : > { %v1010_v33 = vpop.xlane.xlu0 %1009 }
 0x412   : > { %v1011_v34 = vsub.f32 %v1003_v13, %v1010_v33  ;;  %v1632_v33 = vld [vmem:[%s2483_s7] ss:$0 sm:$0xff] }
 0x414   : > { %v1012_v35 = vmul.f32 1.442695, %v1011_v34 }
 0x416   : > { %1906 = vpow2.f32 %v1012_v35 }
 0x419   : > { %v1121_v40 = vpop.xlane.xlu0 %1120 }
 0x41a   : > { %v1122_v41 = vsub.f32 %v1114_v20, %v1121_v40 }
 0x41b   : > { %v1905_v36 = vpop.eup %1904 }
 0x41c   : > { %v903_v37 = vsel %vm734_vm3, %v1905_v36, 0.0  ;;  %v1123_v42 = vmul.f32 1.442695, %v1122_v41 }
 0x41d   : > { %904 = vadd.xlane.f32.xlu1 %v903_v37 }
 0x41e   : > { %1908 = vpow2.f32 %v1123_v42 }
 0x423   : > { %v1907_v38 = vpop.eup %1906 }
 0x424   : > { %v1014_v39 = vsel %vm734_vm3, %v1907_v38, 0.0 }
 0x425   : > { %1015 = vadd.xlane.f32.xlu0 %v1014_v39 }
 0x42b   : > { %v1909_v43 = vpop.eup %1908 }
 0x42c   : > { %v1125_v44 = vsel %vm734_vm3, %v1909_v43, 0.0 }
 0x42e   : > { %910 = vrot.lane.b32.xlu1 %v2302_v47, %s2069_s20 }
 0x431   : > { %v789_v45 = vpop.xlane.xlu0 %788 }
 0x432   : > { %1021 = vrot.lane.b32.xlu1 %v2302_v47, %s2070_s22  ;;  %1910 = vrcp.f32 %v789_v45  ;;  %v1888_v45 = vld [vmem:[#allocation3 + $0x8] sm:$0xff]  }
 0x43b   : > { %797 = vrot.lane.b32.xlu0 %v2302_v47, %s2071_s19 }
 0x43f   : > { %v1911_v48 = vpop.eup %1910 }
 0x440   : > { %v792_v50 = vmul.f32 %v1911_v48, %v1903_v28  ;;  %v1891_v48 = vld [vmem:[%s2488_s12 + $0x30] sm:$0xff]  }
 0x442   : > { %v793_v54 = vpack.c.bf16 %v792_v50, %v792_v50 }
 0x456   : > { %1126 = vadd.xlane.f32.xlu1 %v1125_v44 }
 0x467   : > { %1132 = vrot.lane.b32.xlu1 %v2302_v47, %s2072_s29  ;;  %s2429_s29 = scalar_lea.hbm %s2490_s14, %s1649_s28 }
 0x4a6   : > { %v905_v46 = vpop.xlane.xlu1 %904 }
 0x4a7   : > { %1912 = vrcp.f32 %v905_v46  ;;  %v1890_v46 = vld [vmem:[%s2488_s12 + $0x38] sm:$0xff]  }
 0x4aa   : > { %v911_v53 = vpop.permute.xlu1 %910 }
 0x4ab   : > { %v916_v47 = vsel %vm802_vm5, %v911_v53, 0  ;;  %v1633_v53 = vld [vmem:[%s2484_s8] ss:$0 sm:$0xff] }
 0x4ae   : > { %v1016_v49 = vpop.xlane.xlu0 %1015  ;;  %v1022_v57 = vpop.permute.xlu1 %1021 }
 0x4af   : > { %1914 = vrcp.f32 %v1016_v49  ;;  %v1027_v60 = vsel %vm802_vm5, %v1022_v57, 0 }
 0x4b2   : > { %v798_v51 = vpop.permute.xlu0 %797 }
 0x4b3   : > { %v804_v52 = vsel %vm802_vm5, %v798_v51, 0 }
 0x4b4   : > { %1714 = vmatpush3.bf16.msra.mxu1 %v804_v52  ;;  %v1913_v55 = vpop.eup %1912 }
 0x4b5   : > { %1725 = vmatprep.subr.bf16.mxu1 %v2064_v15  ;;  %v908_v56 = vmul.f32 %v1913_v55, %v1905_v36  ;;  %v1634_v55 = vld [vmem:[%s2485_s9] ss:$0 sm:$0xff] }
 0x4b7   : > { %1716 = vmatmul.mubr.msk.bf16.vlgmr.msra.gmra.mxu1 %vm734_vm3, %v793_v54  ;;  %v909_v58 = vpack.c.bf16 %v908_v56, %v908_v56 }
 0x4b8   : > { %1726 = vmatpush3.bf16.msra.mxu1 %v916_v47  ;;  %1727 = vmatprep.mubr.msk.bf16.mxu1 %vm2065_vm1, %v2064_v15 }
 0x4b9   : > { %1737 = vmatprep.subr.bf16.mxu1 %v2064_v15 }
 0x4bc   : > { %v1915_v59 = vpop.eup %1914 }
 0x4bd   : > { %v1019_v61 = vmul.f32 %v1915_v59, %v1907_v38  ;;  %v1893_v59 = vld [vmem:[%s2488_s12 + $0x20] sm:$0xff]  }
 0x4bf   : > { %1728 = vmatmul.mubr.msk.bf16.vlgmr.msra.gmra.mxu1 %vm734_vm3, %v909_v58  ;;  %v1020_v62 = vpack.c.bf16 %v1019_v61, %v1019_v61  ;;  %v1892_v58 = vld [vmem:[%s2488_s12 + $0x28] sm:$0xff]   ;;  %v1895_v61 = vld [vmem:[%s2488_s12 + $0x10] sm:$0xff]  }
 0x4c0   : > { %1738 = vmatpush3.bf16.msra.mxu1 %v1027_v60  ;;  %1739 = vmatprep.mubr.msk.bf16.mxu1 %vm2065_vm1, %v2064_v15  ;;  %v1894_v60 = vld [vmem:[%s2488_s12 + $0x18] sm:$0xff]  }
 0x4c1   : > { %1749 = vmatprep.subr.bf16.mxu1 %v2064_v15 }
 0x4c7   : > { %1740 = vmatmul.mubr.msk.bf16.vlgmr.msra.gmra.mxu1 %vm734_vm3, %v1020_v62  ;;  %v1896_v62 = vld [vmem:[%s2488_s12 + $0x8] sm:$0xff]  }
 0x4c8   : > { %1751 = vmatprep.mubr.msk.bf16.mxu1 %vm2065_vm1, %v2064_v15 }
 0x4df   : > { %v1127_v63 = vpop.xlane.xlu1 %1126 }
 0x4e0   : > { %1916 = vrcp.f32 %v1127_v63  ;;  %v1897_v63 = vld [vmem:[%s2488_s12] sm:$0xff]  }
 0x4e3   : > { %v1133_v0 = vpop.permute.xlu1 %1132 }
 0x4e4   : > { %v1138_v2 = vsel %vm802_vm5, %v1133_v0, 0  ;;  %v1635_v0 = vld [vmem:[#allocation6] ss:$0 sm:$0xff] }
 0x4e5   : > { %1750 = vmatpush3.bf16.msra.mxu1 %v1138_v2 }
 0x4e6   : > { %1763 = vmatprep.subr.bf16.mxu1 %v2064_v15 }
 0x4ed   : > { %v1917_v3 = vpop.eup %1916 }
 0x4ee   : > { %v1130_v4 = vmul.f32 %v1917_v3, %v1909_v43 }
 0x4f0   : > { %v1131_v5 = vpack.c.bf16 %v1130_v4, %v1130_v4 }
 0x4f2   : > { %1752 = vmatmul.mubr.msk.bf16.vlgmr.msra.gmra.mxu1 %vm734_vm3, %v1131_v5 }
 0x4f3   : > { %1767 = vmatprep.mubr.msk.bf16.mxu1 %vm2065_vm1, %v2064_v15  ;;  %1764 = vmatpush3.bf16.msra.mxu1 %v1888_v45 }
 0x4f4   : > { %1765 = vmatprep.subr.bf16.mxu1 %v2064_v15 }
 0x577   : > { %v840_v6 = vpop.f32.mrf.mxu1 }
 0x579   : > { %v1717_v7 = vpop.f32.mrf.mxu1 }
 0x57b   : > { %v843_v8 = vpop.f32.mrf.mxu1 }
 0x57d   : > { %v1718_v10 = vpop.f32.mrf.mxu1 }
 0x57f   : > { %v952_v12 = vpop.f32.mrf.mxu1 }
 0x580   : > { %1181 = vrot.lane.b32.xlu0 %v952_v12, %s2073_s25  ;;  %s1611_s25 = sshll.u32 %s519_s21, 3 }
 0x581   : > { %v1729_v13 = vpop.f32.mrf.mxu1  ;;  %s521_s24 = scalar_lea.vmem [#allocation8], %s1611_s25  ;;  %s1980_s25 = scalar_lea.vmem %s1979_s18, 256 }
 0x582   : > { %v1647_v13 = vld [vmem:[%s2489_s13] ss:$0 sm:$0xff]  ;;  %s1497_s20 = sshll.u32 %s521_s24, 4  ;;  %s2431_s20 = int_to_ptr.vmem [resolvable:$true] %s1497_s20 }
 0x583   : > { %v955_v14 = vpop.f32.mrf.mxu1  ;;  %s1974_s15 = scalar_lea.vmem %s2431_s20, 128  ;;  %p1981_p0 = scmp.lt.s32.totalorder %s2431_s20, %s1979_s18 }
 0x584   : > { %p1975_p10 = scmp.ne.s32.totalorder %s2431_s20, %s1974_s15  ;;  %p1982_p7 = scmp.lt.s32.totalorder %s1980_s25, %s1974_s15 }
 0x585   : > { %v1730_v16 = vpop.f32.mrf.mxu1 }
 0x586   : > { %p1976_p11 = pnand %p1975_p10, %p2192_p4  ;;  %p1983_p9 = por %p1982_p7, %p1981_p0 }
 0x587   : > { %v1063_v17 = vpop.f32.mrf.mxu1 }
 0x588   : > { %1185 = vrot.lane.b32.xlu1 %v1063_v17, %s2074_s26  ;;  %p1977_p13 = pneg %p1976_p11 }
 0x589   : > { %v1741_v18 = vpop.f32.mrf.mxu1 }
 0x58a   : > { %p1984_p12 = pnand %p1983_p9, %p1977_p13 }
 0x58b   : > { %v1066_v19 = vpop.f32.mrf.mxu1 }
 0x58d   : > { %v1742_v20 = vpop.f32.mrf.mxu1 }
 0x5b2   : > { %v1174_v21 = vpop.f32.mrf.mxu1 }
 0x5b3   : > { %1189 = vrot.lane.b32.xlu0 %v1174_v21, %s2075_s27 }
 0x5b4   : > { %v1753_v22 = vpop.f32.mrf.mxu1 }
 0x5b6   : > { %v1177_v23 = vpop.f32.mrf.mxu1 }
 0x5b8   : > { %v1754_v24 = vpop.f32.mrf.mxu1 }
 0x5f2   : > { %v1182_v25 = vpop.permute.xlu0 %1181 }
 0x5f3   : > { %v1192_v27 = vsel %vm734_vm3, %v840_v6, %v1182_v25 }
 0x5fa   : > { %v1186_v26 = vpop.permute.xlu1 %1185 }
 0x5fb   : > { %v1194_v28 = vsel %vm1193_vm6, %v1192_v27, %v1186_v26 }
 0x625   : > { %v1190_v29 = vpop.permute.xlu0 %1189 }
 0x626   : > { %v1196_v30 = vsel %vm1195_vm7, %v1194_v28, %v1190_v29 }
 0x627   : > { %v1197_v31 = vpack.c.bf16 %v1196_v30, %v1196_v30 }
 0x629   : > { %1760 = vmatmul.mubr.msk.bf16.vlgmr.msra.gmra.mxu0 %vm541_vm0, %v1197_v31 }
 0x62a   : > { %1787 = vmatprep.mubr.msk.bf16.mxu0 %vm2065_vm1, %v2064_v15  ;;  %1772 = vmatpush3.bf16.msra.mxu0 %v1890_v46 }
 0x62b   : > { %1773 = vmatprep.subr.bf16.mxu0 %v2064_v15 }
 0x62e   : > { %1774 = vmatpush3.bf16.msra.mxu0 %v1891_v48 }
 0x62f   : > { %1775 = vmatprep.subr.bf16.mxu0 %v2064_v15 }
 0x632   : > { %1776 = vmatpush3.bf16.msra.mxu0 %v1892_v58 }
 0x633   : > { %1777 = vmatprep.subr.bf16.mxu0 %v2064_v15 }
 0x636   : > { %1778 = vmatpush3.bf16.msra.mxu0 %v1893_v59 }
 0x637   : > { %1779 = vmatprep.subr.bf16.mxu0 %v2064_v15 }
 0x63a   : > { %1780 = vmatpush3.bf16.msra.mxu0 %v1894_v60 }
 0x63b   : > { %1781 = vmatprep.subr.bf16.mxu0 %v2064_v15 }
 0x63e   : > { %1782 = vmatpush3.bf16.msra.mxu0 %v1895_v61 }
 0x63f   : > { %1783 = vmatprep.subr.bf16.mxu0 %v2064_v15 }
 0x642   : > { %1784 = vmatpush3.bf16.msra.mxu0 %v1896_v62 }
 0x643   : > { %1785 = vmatprep.subr.bf16.mxu0 %v2064_v15 }
 0x646   : > { %1786 = vmatpush3.bf16.msra.mxu0 %v1897_v63 }
 0x6e9   : > { %v1251_v32 = vpop.f32.mrf.mxu0 }
 0x6ea   : > { %v1257_v34 = vadd.f32 %v1251_v32, %v2259_v1  ;;  %v1889_v1 = vld [vmem:[#allocation3] sm:$0xff]  }
 0x6eb   : > { %v1761_v35 = vpop.f32.mrf.mxu0  ;;  %1766 = vmatpush3.bf16.msra.mxu1 %v1889_v1 }
 0x6ec   : > { %v2375_v36 = vadd.f32 %v1632_v33, %v1257_v34 }
 0x6ed   : > { %v1254_v37 = vpop.f32.mrf.mxu0 }
 0x6ee   : > { %v1268_v38 = vsel %vm541_vm0, %v2375_v36, 0.0 }
 0x6ef   : > { %1269 = vadd.xlane.f32.xlu1 %v1268_v38  ;;  %v1762_v39 = vpop.f32.mrf.mxu0 }
 0x778   : > { %v1270_v40 = vpop.xlane.xlu1 %1269 }
 0x779   : > { %v1271_v41 = vmul.f32 0.03125, %v1270_v40 }
 0x77b   : > { %v1272_v42 = vsub.f32 %v2375_v36, %v1271_v41 }
 0x77d   : > { %v1273_v43 = vmul.f32 %v1272_v42, %v1272_v42 }
 0x77f   : > { %v1274_v44 = vsel %vm541_vm0, %v1273_v43, 0.0 }
 0x780   : > { %1275 = vadd.xlane.f32.xlu0 %v1274_v44 }
 0x809   : > { %v1276_v49 = vpop.xlane.xlu0 %1275 }
 0x80a   : > { %v1277_v50 = vmul.f32 0.03125, %v1276_v49 }
 0x80c   : > { %v1278_v51 = vadd.f32 1e-05, %v1277_v50 }
 0x80e   : > { %1918 = vrsqrt.f32 %v1278_v51 }
 0x81b   : > { %v1919_v52 = vpop.eup %1918 }
 0x81c   : > { %v1280_v54 = vmul.f32 %v1919_v52, %v1272_v42 }
 0x81e   : > { %v1287_v47 = vmul.f32 %v1633_v53, %v1280_v54 }
 0x820   : > { %v1294_v56 = vadd.f32 %v1634_v55, %v1287_v47 }
 0x822   : > { %v1295_v57 = vpack.c.bf16 %v1294_v56, %v1294_v56 }
 0x824   : > { %1768 = vmatmul.mubr.msk.bf16.vlgmr.msra.gmra.mxu1 %vm541_vm0, %v1295_v57 }
 0x8e4   : > { %v1356_v2 = vpop.f32.mrf.mxu1 }
 0x8e5   : > { %v1357_v3 = vadd.f32 %v1635_v0, %v1356_v2 }
 0x8e6   : > { %v1769_v4 = vpop.f32.mrf.mxu1 }
 0x8e7   : > { %v1363_v5 = vmul.f32 0.70710677, %v1357_v3  ;;  %v1362_v9 = vmul.f32 0.5, %v1357_v3 }
 0x8e8   : > { %v1359_v6 = vpop.f32.mrf.mxu1 }
 0x8e9   : > { %1920 = verf.f32 %v1363_v5 }
 0x8ea   : > { %v1770_v7 = vpop.f32.mrf.mxu1 }
 0x8f6   : > { %v1921_v8 = vpop.eup %1920 }
 0x8f7   : > { %v1365_v10 = vadd.f32 1.0, %v1921_v8 }
 0x8f9   : > { %v1366_v11 = vmul.f32 %v1365_v10, %v1362_v9 }
 0x8fb   : > { %v1367_v15 = vpack.c.bf16 %v1366_v11, %v1366_v11 }
 0x8fd   : > { %1788 = vmatmul.mubr.bf16.vlgmr.msra.gmra.mxu0 %v1367_v15 }
 0x9bd   : > { %v1466_v12 = vpop.f32.mrf.mxu0 }
 0x9be   : > { %v1472_v14 = vadd.f32 %v1466_v12, %v2375_v36 }
 0x9bf   : > { %v1789_v16 = vpop.f32.mrf.mxu0 }
 0x9c0   : > { %v1480_v17 = vadd.f32 %v1647_v13, %v1472_v14 }
 0x9c1   : > { %v1469_v18 = vpop.f32.mrf.mxu0 }
 0x9c2   : > { %1481 = vst.msk [vmem:[%s521_s24] sm:$0xff] %vm541_vm0, %v1480_v17 }
 0x9c3   : > { %v1790_v19 = vpop.f32.mrf.mxu0 }
 0x9c4   : > { %1987 = shalt.err (!%p1984_p12)
}
 0x9c5   : > { %s1988_s26 = scalar_lea.hbm %s2429_s29, 128  ;;  %s1992_s28 = scalar_lea.hbm %s2490_s14, 256 }
 0x9c6   : > { %p1989_p1 = scmp.ne.s32.totalorder %s2429_s29, %s1988_s26  ;;  %p1993_p3 = scmp.lt.s32.totalorder %s2429_s29, %s2490_s14 }
 0x9c7   : > { %p1994_p6 = scmp.lt.s32.totalorder %s1992_s28, %s1988_s26 }
 0x9c8   : > { %p1990_p2 = pnand %p1989_p1, %p2192_p4 }
 0x9c9   : > { %p1995_p8 = por %p1994_p6, %p1993_p3 }
 0x9ca   : > { %p1991_p5 = pneg %p1990_p2 }
 0x9cc   : > { %p1996_p10 = pnand %p1995_p8, %p1991_p5 }
 0x9ce   : > { %1999 = shalt.err (!%p1996_p10)
}
 0x9cf   : > { %1799 = dma.vmem_to_hbm [thread:$0]  (%p2192_p4), %s2431_s20, 128, %s2429_s29, %s1483_s16  }
 0x9d0 PF: > { %s2510_s19 = sld [smem:[#allocation15_spill]] }
 0x9d1   : > { %s2511_s15 = sld [smem:[#allocation12_spill]] }
 0x9d2   : > { %s2512_s17 = sld [smem:[#allocation17_spill]] }
 0x9d6   : > { %p1816_p11 = scmp.ge.s32.totalorder %s2510_s19, 2 }
 0x9d7   : > { %s1509_s18 = sand.u32 1, %s2511_s15  }
 0x9d8   : > { %p2513_p13 = scmp.ne.s32.totalorder %s2512_s17, 0  ;;  %s1510_s25 = scalar_lea.sflag [#allocation5], %s1509_s18 }
 0x9da   : > { %p1809_p0 = pnand %p1816_p11, %p2513_p13 }
 0x9dc   : > { %p1810_p7 = pneg %p1809_p0 }
 0x9de   : > { %2033 = dma.done.wait (%p1810_p7), %s1510_s25, 128  }
 0x9df   : > { %2035 = vsyncadd (%p1810_p7), %s1510_s25, 4294967168  ;;  %s29_s18 = sadd.s32 1, %s2510_s19   ;;  %s2514_s23 = sld [smem:[#allocation13_spill]] }
 0x9e0   : > { %p26_p9 = scmp.ge.s32.totalorder %s29_s18, 4   ;;  %s2515_s15 = sld [smem:[#allocation18_spill]] }
 0x9e1   : > { %s2516_s16 = sld [smem:[#allocation14_spill]]  ;;  %s2518_s29 = smov %s2042_s30 }
 0x9e2   : > { %s2517_s17 = sld [smem:[#allocation16_spill]]  ;;  %28 = sbr.rel (!%p26_p9) target bundleno = 6 (0x6), region = 127 }
 0x9e5   : > { %s2519_s30 = smov %s2514_s23 }
 0x9e7   :  { %1515 = vsyncpa [#allocation4], 1 }
 0x9e8   :  { %1517 = vsyncpa [#allocation4 + $0x1], 1 }
 0x9e9   :  { %1518 = vsyncpa [#allocation7], 1 }
 0x9ea   :  { %1519 = vsyncpa [#allocation5], 1 }
 0x9eb   :  { %1521 = vsyncpa [#allocation5 + $0x1], 1 }

</bundles_post_ra>
